<compile_context>
chip_gen: v5e
topology: v5e:2x2
jax: 0.10.0
libtpu: 0.0.40
codegen_flags: <defaults>
</compile_context>

<pallas_src>
import functools

import jax
import jax.numpy as jnp
from jax import lax
from jax.experimental import pallas as pl
from jax.experimental.pallas import tpu as pltpu


def _masked_conv3d_kernel(x_ref, w_ref, b_ref, o_ref, *, bt, kh, hw, wd):
    """One (batch, time-chunk) x (Cout tile) block of the conv-as-matmul.

    x_ref: (1, bt, Hp*W, K)   K = kt*kw*Cin  (dt/dw shifts pre-folded into channels)
    w_ref: (kh, K, TN)        one (K, TN) weight slab per dh shift
    b_ref: (1, TN)
    o_ref: (1, bt*H*W, TN)
    """
    tn = o_ref.shape[-1]
    bias = b_ref[0, :].astype(jnp.float32)[None, :]
    for j in range(bt):                          # static, fully unrolled
        acc = jnp.zeros((hw, tn), jnp.float32)
        for dh in range(kh):                     # kh overlapping H-windows, sliced in VMEM
            win = x_ref[0, j, dh * wd:dh * wd + hw, :]
            acc = acc + jnp.dot(win, w_ref[dh],
                                preferred_element_type=jnp.float32)
        o_ref[0, j * hw:(j + 1) * hw, :] = (acc + bias).astype(o_ref.dtype)


def _round_up(v, m):
    return (v + m - 1) // m * m


def _pick_time_chunk(t, hw, hpw, k, kh, tn, x_bytes, o_bytes,
                     target_rows=2048, vmem_budget=24 * 2**20):
    """Largest divisor `bt` of T with bt*H*W <= target_rows and tiles within budget."""
    best = 1
    w_bytes = kh * k * tn * x_bytes              # resident weight slab
    for cand in range(1, t + 1):
        if t % cand:
            continue
        rows = cand * hw
        need = 2 * cand * hpw * k * x_bytes + 2 * rows * tn * o_bytes + w_bytes
        if rows <= max(target_rows, hw) and need <= vmem_budget:
            best = cand
    return best


def masked_conv3d(x_ncthw, weight, bias, kernel_size, compute_dtype=None):
    """Equivalent of MaskedConv3d.forward.

    x_ncthw: (N, Cin, T, H, W)   weight: (Cout, Cin, kt, kh, kw)   bias: (Cout,)
    returns: (N, Cout, T, H, W)
    compute_dtype: optionally cast activations/weights (e.g. jnp.bfloat16 on
      v6e/v7x); accumulation always stays f32.
    """
    kt, kh, kw = kernel_size
    n, cin, t, h, w = x_ncthw.shape
    cout = weight.shape[0]
    causal = kw // 2
    out_dtype = x_ncthw.dtype

    # --- causal weight mask (mirrors the in-place zero_() in forward()) ---
    # TODO(synk): the PyTorch module mutates conv.weight.data persistently across
    # forward() calls; here the mask is applied functionally per call.
    w_masked = weight
    if causal > 0:
        mask = jnp.ones((kt, kh, kw), weight.dtype).at[-1, -1, causal:].set(0.0)
        w_masked = weight * mask[None, None]

    # --- causal padding == F.pad(x, [kw//2, kw//2, kh-1, 0, kt-1, 0]) ---
    x = jnp.transpose(x_ncthw, (0, 2, 3, 4, 1))                  # (N, T, H, W, Cin)
    x_pad = jnp.pad(
        x, ((0, 0), (kt - 1, 0), (kh - 1, 0), (causal, causal), (0, 0)))
    hp = h + kh - 1

    # --- fold (dt, dw) shifts into the channel axis: (N, T, Hp, W, kt*kw*Cin) ---
    pieces = []
    for dt in range(kt):
        for dw in range(kw):
            pieces.append(lax.slice(x_pad, (0, dt, 0, dw, 0),
                                    (n, dt + t, hp, dw + w, cin)))
    x2 = jnp.concatenate(pieces, axis=-1)
    k_dim = kt * kw * cin

    # --- weights (kh, K, Coutp), bias (1, Coutp); Cout padded to lane width ---
    coutp = _round_up(cout, 128)
    w3 = jnp.transpose(w_masked, (3, 2, 4, 1, 0)).reshape(kh, k_dim, cout)
    w3 = jnp.pad(w3, ((0, 0), (0, 0), (0, coutp - cout)))
    b2 = jnp.pad(bias, (0, coutp - cout)).reshape(1, coutp)

    if compute_dtype is not None:
        x2 = x2.astype(compute_dtype)
        w3 = w3.astype(compute_dtype)

    # --- tiling: `bt` time steps per grid step; Cout tiled if large ---
    hw_rows = h * w
    hpw = hp * w
    if coutp <= 512:
        tn = coutp
    elif coutp % 512 == 0:
        tn = 512
    elif coutp % 256 == 0:
        tn = 256
    else:
        tn = 128
    x_bytes = jnp.dtype(x2.dtype).itemsize
    o_bytes = jnp.dtype(out_dtype).itemsize
    bt = _pick_time_chunk(t, hw_rows, hpw, k_dim, kh, tn, x_bytes, o_bytes)
    ntb = (n * t) // bt
    rows = bt * hw_rows
    # TODO(synk): for very large H*W an additional H-halo tiling axis would be
    # needed; here one spatial slab per time step is assumed to fit VMEM.

    x2g = x2.reshape(n * t, hpw, k_dim).reshape(ntb, bt, hpw, k_dim)

    kernel = functools.partial(_masked_conv3d_kernel,
                               bt=bt, kh=kh, hw=hw_rows, wd=w)

    flops = 2 * n * t * h * w * kt * kh * kw * cin * cout
    bytes_accessed = (x2g.size * x_bytes + w3.size * x_bytes
                      + b2.size * 4 + ntb * rows * coutp * o_bytes)

    out_g = pl.pallas_call(
        kernel,
        out_shape=jax.ShapeDtypeStruct((ntb, rows, coutp), out_dtype),
        grid_spec=pltpu.PrefetchScalarGridSpec(
            num_scalar_prefetch=0,
            grid=(ntb, coutp // tn),
            in_specs=[
                pl.BlockSpec((1, bt, hpw, k_dim), lambda i, j: (i, 0, 0, 0)),
                pl.BlockSpec((kh, k_dim, tn), lambda i, j: (0, 0, j)),
                pl.BlockSpec((1, tn), lambda i, j: (0, j)),
            ],
            out_specs=pl.BlockSpec((1, rows, tn), lambda i, j: (i, 0, j)),
        ),
        compiler_params=pltpu.CompilerParams(
            dimension_semantics=("parallel", "parallel"),
            vmem_limit_bytes=64 * 1024 * 1024),
        cost_estimate=pl.CostEstimate(
            flops=int(flops), transcendentals=0,
            bytes_accessed=int(bytes_accessed)),
    )(x2g, w3, b2)

    out = out_g.reshape(n, t, h, w, coutp)[..., :cout]
    return jnp.transpose(out, (0, 4, 1, 2, 3))                   # (N, Cout, T, H, W)


if __name__ == "__main__":
    key = jax.random.PRNGKey(0)
    k_x, k_b = jax.random.split(key)

    N, Cin, Cout = 2, 4, 8
    T, H, W = 4, 8, 8
    kernel_size = (3, 3, 3)
    kt, kh, kw = kernel_size

    x = jax.random.normal(k_x, (N, Cin, T, H, W), jnp.float32)

    # Module __init__ sets conv.weight.data to all-ones.
    weight = jnp.ones((Cout, Cin, kt, kh, kw), jnp.float32)
    # Deterministic bias (PyTorch Conv3d default: U(-1/sqrt(fan_in), 1/sqrt(fan_in))).
    fan_in = Cin * kt * kh * kw
    bound = 1.0 / (fan_in ** 0.5)
    bias = jax.random.uniform(k_b, (Cout,), jnp.float32, -bound, bound)

    out = masked_conv3d(x, weight, bias, kernel_size)
    out = jax.block_until_ready(out)

    # Pure-JAX reference implementing the same forward semantics.
    causal = kw // 2
    w_ref = weight
    if causal > 0:
        mask = jnp.ones((kt, kh, kw), jnp.float32).at[-1, -1, causal:].set(0.0)
        w_ref = weight * mask[None, None]
    x_pad = jnp.pad(x, ((0, 0), (0, 0), (kt - 1, 0), (kh - 1, 0),
                        (causal, causal)))
    ref = lax.conv_general_dilated(
        x_pad, w_ref, (1, 1, 1), "VALID",
        dimension_numbers=("NCDHW", "OIDHW", "NCDHW"))
    ref = ref + bias[None, :, None, None, None]

    assert out.shape == (N, Cout, T, H, W)
    assert jnp.allclose(out, ref, atol=1e-3, rtol=1e-3)
    print("KERNEL_OK")
</pallas_src>

<mosaic_0001>
module attributes {stable_mosaic.version = 11 : i64} {
  func.func @_masked_conv3d_kernel(%arg0: i32, %arg1: i32, %arg2: memref<1x4x80x36xf32, #tpu.memory_space<vmem>>, %arg3: memref<3x36x128xf32, #tpu.memory_space<vmem>>, %arg4: memref<1x128xf32, #tpu.memory_space<vmem>>, %arg5: memref<1x256x128xf32, #tpu.memory_space<vmem>>) attributes {dimension_semantics = [#tpu.dimension_semantics<parallel>, #tpu.dimension_semantics<parallel>], iteration_bounds = array<i64: 2, 1>, scalar_prefetch = 0 : i64, scratch_operands = 0 : i64, tpu.core_type = #tpu.core_type<tc>, window_params = [{transform_indices = @transform_0, window_bounds = array<i64: 1, 4, 80, 36>}, {transform_indices = @transform_1, window_bounds = array<i64: 3, 36, 128>}, {transform_indices = @transform_2, window_bounds = array<i64: 1, 128>}, {transform_indices = @transform_3, window_bounds = array<i64: 1, 256, 128>}]} {
    %c0 = arith.constant 0 : index
    %c0_0 = arith.constant 0 : index
    %0 = vector.load %arg4[%c0, %c0_0] : memref<1x128xf32, #tpu.memory_space<vmem>>, vector<1x128xf32>
    %1 = vector.shape_cast %0 : vector<1x128xf32> to vector<128xf32>
    %2 = vector.shape_cast %1 : vector<128xf32> to vector<1x128xf32>
    %cst = arith.constant 0.000000e+00 : f32
    %3 = vector.broadcast %cst : f32 to vector<64x128xf32>
    %c0_1 = arith.constant 0 : index
    %c0_2 = arith.constant 0 : index
    %c0_3 = arith.constant 0 : index
    %c0_4 = arith.constant 0 : index
    %4 = vector.load %arg2[%c0_1, %c0_2, %c0_3, %c0_4] : memref<1x4x80x36xf32, #tpu.memory_space<vmem>>, vector<1x1x64x36xf32>
    %5 = vector.shape_cast %4 : vector<1x1x64x36xf32> to vector<64x36xf32>
    %c0_5 = arith.constant 0 : index
    %c0_6 = arith.constant 0 : index
    %c0_7 = arith.constant 0 : index
    %6 = vector.load %arg3[%c0_5, %c0_6, %c0_7] : memref<3x36x128xf32, #tpu.memory_space<vmem>>, vector<1x36x128xf32>
    %7 = vector.shape_cast %6 : vector<1x36x128xf32> to vector<36x128xf32>
    %cst_8 = arith.constant dense<0.000000e+00> : vector<64x128xf32>
    %8 = tpu.matmul %5, %7, %cst_8 {dimension_numbers = #tpu.dot_dimension_numbers<[1], [0], [0], [1], [0, 0, 1, 1], [], []>} : vector<64x36xf32>, vector<36x128xf32>, vector<64x128xf32> -> vector<64x128xf32>
    %9 = arith.addf %3, %8 : vector<64x128xf32>
    %c0_9 = arith.constant 0 : index
    %c0_10 = arith.constant 0 : index
    %c8 = arith.constant 8 : index
    %c0_11 = arith.constant 0 : index
    %10 = vector.load %arg2[%c0_9, %c0_10, %c8, %c0_11] : memref<1x4x80x36xf32, #tpu.memory_space<vmem>>, vector<1x1x64x36xf32>
    %11 = vector.shape_cast %10 : vector<1x1x64x36xf32> to vector<64x36xf32>
    %c1 = arith.constant 1 : index
    %c0_12 = arith.constant 0 : index
    %c0_13 = arith.constant 0 : index
    %12 = vector.load %arg3[%c1, %c0_12, %c0_13] : memref<3x36x128xf32, #tpu.memory_space<vmem>>, vector<1x36x128xf32>
    %13 = vector.shape_cast %12 : vector<1x36x128xf32> to vector<36x128xf32>
    %cst_14 = arith.constant dense<0.000000e+00> : vector<64x128xf32>
    %14 = tpu.matmul %11, %13, %cst_14 {dimension_numbers = #tpu.dot_dimension_numbers<[1], [0], [0], [1], [0, 0, 1, 1], [], []>} : vector<64x36xf32>, vector<36x128xf32>, vector<64x128xf32> -> vector<64x128xf32>
    %15 = arith.addf %9, %14 : vector<64x128xf32>
    %c0_15 = arith.constant 0 : index
    %c0_16 = arith.constant 0 : index
    %c16 = arith.constant 16 : index
    %c0_17 = arith.constant 0 : index
    %16 = vector.load %arg2[%c0_15, %c0_16, %c16, %c0_17] : memref<1x4x80x36xf32, #tpu.memory_space<vmem>>, vector<1x1x64x36xf32>
    %17 = vector.shape_cast %16 : vector<1x1x64x36xf32> to vector<64x36xf32>
    %c2 = arith.constant 2 : index
    %c0_18 = arith.constant 0 : index
    %c0_19 = arith.constant 0 : index
    %18 = vector.load %arg3[%c2, %c0_18, %c0_19] : memref<3x36x128xf32, #tpu.memory_space<vmem>>, vector<1x36x128xf32>
    %19 = vector.shape_cast %18 : vector<1x36x128xf32> to vector<36x128xf32>
    %cst_20 = arith.constant dense<0.000000e+00> : vector<64x128xf32>
    %20 = tpu.matmul %17, %19, %cst_20 {dimension_numbers = #tpu.dot_dimension_numbers<[1], [0], [0], [1], [0, 0, 1, 1], [], []>} : vector<64x36xf32>, vector<36x128xf32>, vector<64x128xf32> -> vector<64x128xf32>
    %21 = arith.addf %15, %20 : vector<64x128xf32>
    %22 = vector.broadcast %2 : vector<1x128xf32> to vector<64x128xf32>
    %23 = arith.addf %21, %22 : vector<64x128xf32>
    %c0_21 = arith.constant 0 : index
    %c0_22 = arith.constant 0 : index
    %c0_23 = arith.constant 0 : index
    %24 = vector.load %arg5[%c0_21, %c0_22, %c0_23] : memref<1x256x128xf32, #tpu.memory_space<vmem>>, vector<1x64x128xf32>
    %25 = vector.shape_cast %24 : vector<1x64x128xf32> to vector<64x128xf32>
    %26 = vector.shape_cast %23 : vector<64x128xf32> to vector<1x64x128xf32>
    tpu.vector_store %arg5[%c0_21, %c0_22, %c0_23], %26 {strides = array<i32>} : memref<1x256x128xf32, #tpu.memory_space<vmem>>, vector<1x64x128xf32>,
    %cst_24 = arith.constant 0.000000e+00 : f32
    %27 = vector.broadcast %cst_24 : f32 to vector<64x128xf32>
    %c0_25 = arith.constant 0 : index
    %c1_26 = arith.constant 1 : index
    %c0_27 = arith.constant 0 : index
    %c0_28 = arith.constant 0 : index
    %28 = vector.load %arg2[%c0_25, %c1_26, %c0_27, %c0_28] : memref<1x4x80x36xf32, #tpu.memory_space<vmem>>, vector<1x1x64x36xf32>
    %29 = vector.shape_cast %28 : vector<1x1x64x36xf32> to vector<64x36xf32>
    %c0_29 = arith.constant 0 : index
    %c0_30 = arith.constant 0 : index
    %c0_31 = arith.constant 0 : index
    %30 = vector.load %arg3[%c0_29, %c0_30, %c0_31] : memref<3x36x128xf32, #tpu.memory_space<vmem>>, vector<1x36x128xf32>
    %31 = vector.shape_cast %30 : vector<1x36x128xf32> to vector<36x128xf32>
    %cst_32 = arith.constant dense<0.000000e+00> : vector<64x128xf32>
    %32 = tpu.matmul %29, %31, %cst_32 {dimension_numbers = #tpu.dot_dimension_numbers<[1], [0], [0], [1], [0, 0, 1, 1], [], []>} : vector<64x36xf32>, vector<36x128xf32>, vector<64x128xf32> -> vector<64x128xf32>
    %33 = arith.addf %27, %32 : vector<64x128xf32>
    %c0_33 = arith.constant 0 : index
    %c1_34 = arith.constant 1 : index
    %c8_35 = arith.constant 8 : index
    %c0_36 = arith.constant 0 : index
    %34 = vector.load %arg2[%c0_33, %c1_34, %c8_35, %c0_36] : memref<1x4x80x36xf32, #tpu.memory_space<vmem>>, vector<1x1x64x36xf32>
    %35 = vector.shape_cast %34 : vector<1x1x64x36xf32> to vector<64x36xf32>
    %c1_37 = arith.constant 1 : index
    %c0_38 = arith.constant 0 : index
    %c0_39 = arith.constant 0 : index
    %36 = vector.load %arg3[%c1_37, %c0_38, %c0_39] : memref<3x36x128xf32, #tpu.memory_space<vmem>>, vector<1x36x128xf32>
    %37 = vector.shape_cast %36 : vector<1x36x128xf32> to vector<36x128xf32>
    %cst_40 = arith.constant dense<0.000000e+00> : vector<64x128xf32>
    %38 = tpu.matmul %35, %37, %cst_40 {dimension_numbers = #tpu.dot_dimension_numbers<[1], [0], [0], [1], [0, 0, 1, 1], [], []>} : vector<64x36xf32>, vector<36x128xf32>, vector<64x128xf32> -> vector<64x128xf32>
    %39 = arith.addf %33, %38 : vector<64x128xf32>
    %c0_41 = arith.constant 0 : index
    %c1_42 = arith.constant 1 : index
    %c16_43 = arith.constant 16 : index
    %c0_44 = arith.constant 0 : index
    %40 = vector.load %arg2[%c0_41, %c1_42, %c16_43, %c0_44] : memref<1x4x80x36xf32, #tpu.memory_space<vmem>>, vector<1x1x64x36xf32>
    %41 = vector.shape_cast %40 : vector<1x1x64x36xf32> to vector<64x36xf32>
    %c2_45 = arith.constant 2 : index
    %c0_46 = arith.constant 0 : index
    %c0_47 = arith.constant 0 : index
    %42 = vector.load %arg3[%c2_45, %c0_46, %c0_47] : memref<3x36x128xf32, #tpu.memory_space<vmem>>, vector<1x36x128xf32>
    %43 = vector.shape_cast %42 : vector<1x36x128xf32> to vector<36x128xf32>
    %cst_48 = arith.constant dense<0.000000e+00> : vector<64x128xf32>
    %44 = tpu.matmul %41, %43, %cst_48 {dimension_numbers = #tpu.dot_dimension_numbers<[1], [0], [0], [1], [0, 0, 1, 1], [], []>} : vector<64x36xf32>, vector<36x128xf32>, vector<64x128xf32> -> vector<64x128xf32>
    %45 = arith.addf %39, %44 : vector<64x128xf32>
    %46 = vector.broadcast %2 : vector<1x128xf32> to vector<64x128xf32>
    %47 = arith.addf %45, %46 : vector<64x128xf32>
    %c0_49 = arith.constant 0 : index
    %c64 = arith.constant 64 : index
    %c0_50 = arith.constant 0 : index
    %48 = vector.load %arg5[%c0_49, %c64, %c0_50] : memref<1x256x128xf32, #tpu.memory_space<vmem>>, vector<1x64x128xf32>
    %49 = vector.shape_cast %48 : vector<1x64x128xf32> to vector<64x128xf32>
    %50 = vector.shape_cast %47 : vector<64x128xf32> to vector<1x64x128xf32>
    tpu.vector_store %arg5[%c0_49, %c64, %c0_50], %50 {strides = array<i32>} : memref<1x256x128xf32, #tpu.memory_space<vmem>>, vector<1x64x128xf32>,
    %cst_51 = arith.constant 0.000000e+00 : f32
    %51 = vector.broadcast %cst_51 : f32 to vector<64x128xf32>
    %c0_52 = arith.constant 0 : index
    %c2_53 = arith.constant 2 : index
    %c0_54 = arith.constant 0 : index
    %c0_55 = arith.constant 0 : index
    %52 = vector.load %arg2[%c0_52, %c2_53, %c0_54, %c0_55] : memref<1x4x80x36xf32, #tpu.memory_space<vmem>>, vector<1x1x64x36xf32>
    %53 = vector.shape_cast %52 : vector<1x1x64x36xf32> to vector<64x36xf32>
    %c0_56 = arith.constant 0 : index
    %c0_57 = arith.constant 0 : index
    %c0_58 = arith.constant 0 : index
    %54 = vector.load %arg3[%c0_56, %c0_57, %c0_58] : memref<3x36x128xf32, #tpu.memory_space<vmem>>, vector<1x36x128xf32>
    %55 = vector.shape_cast %54 : vector<1x36x128xf32> to vector<36x128xf32>
    %cst_59 = arith.constant dense<0.000000e+00> : vector<64x128xf32>
    %56 = tpu.matmul %53, %55, %cst_59 {dimension_numbers = #tpu.dot_dimension_numbers<[1], [0], [0], [1], [0, 0, 1, 1], [], []>} : vector<64x36xf32>, vector<36x128xf32>, vector<64x128xf32> -> vector<64x128xf32>
    %57 = arith.addf %51, %56 : vector<64x128xf32>
    %c0_60 = arith.constant 0 : index
    %c2_61 = arith.constant 2 : index
    %c8_62 = arith.constant 8 : index
    %c0_63 = arith.constant 0 : index
    %58 = vector.load %arg2[%c0_60, %c2_61, %c8_62, %c0_63] : memref<1x4x80x36xf32, #tpu.memory_space<vmem>>, vector<1x1x64x36xf32>
    %59 = vector.shape_cast %58 : vector<1x1x64x36xf32> to vector<64x36xf32>
    %c1_64 = arith.constant 1 : index
    %c0_65 = arith.constant 0 : index
    %c0_66 = arith.constant 0 : index
    %60 = vector.load %arg3[%c1_64, %c0_65, %c0_66] : memref<3x36x128xf32, #tpu.memory_space<vmem>>, vector<1x36x128xf32>
    %61 = vector.shape_cast %60 : vector<1x36x128xf32> to vector<36x128xf32>
    %cst_67 = arith.constant dense<0.000000e+00> : vector<64x128xf32>
    %62 = tpu.matmul %59, %61, %cst_67 {dimension_numbers = #tpu.dot_dimension_numbers<[1], [0], [0], [1], [0, 0, 1, 1], [], []>} : vector<64x36xf32>, vector<36x128xf32>, vector<64x128xf32> -> vector<64x128xf32>
    %63 = arith.addf %57, %62 : vector<64x128xf32>
    %c0_68 = arith.constant 0 : index
    %c2_69 = arith.constant 2 : index
    %c16_70 = arith.constant 16 : index
    %c0_71 = arith.constant 0 : index
    %64 = vector.load %arg2[%c0_68, %c2_69, %c16_70, %c0_71] : memref<1x4x80x36xf32, #tpu.memory_space<vmem>>, vector<1x1x64x36xf32>
    %65 = vector.shape_cast %64 : vector<1x1x64x36xf32> to vector<64x36xf32>
    %c2_72 = arith.constant 2 : index
    %c0_73 = arith.constant 0 : index
    %c0_74 = arith.constant 0 : index
    %66 = vector.load %arg3[%c2_72, %c0_73, %c0_74] : memref<3x36x128xf32, #tpu.memory_space<vmem>>, vector<1x36x128xf32>
    %67 = vector.shape_cast %66 : vector<1x36x128xf32> to vector<36x128xf32>
    %cst_75 = arith.constant dense<0.000000e+00> : vector<64x128xf32>
    %68 = tpu.matmul %65, %67, %cst_75 {dimension_numbers = #tpu.dot_dimension_numbers<[1], [0], [0], [1], [0, 0, 1, 1], [], []>} : vector<64x36xf32>, vector<36x128xf32>, vector<64x128xf32> -> vector<64x128xf32>
    %69 = arith.addf %63, %68 : vector<64x128xf32>
    %70 = vector.broadcast %2 : vector<1x128xf32> to vector<64x128xf32>
    %71 = arith.addf %69, %70 : vector<64x128xf32>
    %c0_76 = arith.constant 0 : index
    %c128 = arith.constant 128 : index
    %c0_77 = arith.constant 0 : index
    %72 = vector.load %arg5[%c0_76, %c128, %c0_77] : memref<1x256x128xf32, #tpu.memory_space<vmem>>, vector<1x64x128xf32>
    %73 = vector.shape_cast %72 : vector<1x64x128xf32> to vector<64x128xf32>
    %74 = vector.shape_cast %71 : vector<64x128xf32> to vector<1x64x128xf32>
    tpu.vector_store %arg5[%c0_76, %c128, %c0_77], %74 {strides = array<i32>} : memref<1x256x128xf32, #tpu.memory_space<vmem>>, vector<1x64x128xf32>,
    %cst_78 = arith.constant 0.000000e+00 : f32
    %75 = vector.broadcast %cst_78 : f32 to vector<64x128xf32>
    %c0_79 = arith.constant 0 : index
    %c3 = arith.constant 3 : index
    %c0_80 = arith.constant 0 : index
    %c0_81 = arith.constant 0 : index
    %76 = vector.load %arg2[%c0_79, %c3, %c0_80, %c0_81] : memref<1x4x80x36xf32, #tpu.memory_space<vmem>>, vector<1x1x64x36xf32>
    %77 = vector.shape_cast %76 : vector<1x1x64x36xf32> to vector<64x36xf32>
    %c0_82 = arith.constant 0 : index
    %c0_83 = arith.constant 0 : index
    %c0_84 = arith.constant 0 : index
    %78 = vector.load %arg3[%c0_82, %c0_83, %c0_84] : memref<3x36x128xf32, #tpu.memory_space<vmem>>, vector<1x36x128xf32>
    %79 = vector.shape_cast %78 : vector<1x36x128xf32> to vector<36x128xf32>
    %cst_85 = arith.constant dense<0.000000e+00> : vector<64x128xf32>
    %80 = tpu.matmul %77, %79, %cst_85 {dimension_numbers = #tpu.dot_dimension_numbers<[1], [0], [0], [1], [0, 0, 1, 1], [], []>} : vector<64x36xf32>, vector<36x128xf32>, vector<64x128xf32> -> vector<64x128xf32>
    %81 = arith.addf %75, %80 : vector<64x128xf32>
    %c0_86 = arith.constant 0 : index
    %c3_87 = arith.constant 3 : index
    %c8_88 = arith.constant 8 : index
    %c0_89 = arith.constant 0 : index
    %82 = vector.load %arg2[%c0_86, %c3_87, %c8_88, %c0_89] : memref<1x4x80x36xf32, #tpu.memory_space<vmem>>, vector<1x1x64x36xf32>
    %83 = vector.shape_cast %82 : vector<1x1x64x36xf32> to vector<64x36xf32>
    %c1_90 = arith.constant 1 : index
    %c0_91 = arith.constant 0 : index
    %c0_92 = arith.constant 0 : index
    %84 = vector.load %arg3[%c1_90, %c0_91, %c0_92] : memref<3x36x128xf32, #tpu.memory_space<vmem>>, vector<1x36x128xf32>
    %85 = vector.shape_cast %84 : vector<1x36x128xf32> to vector<36x128xf32>
    %cst_93 = arith.constant dense<0.000000e+00> : vector<64x128xf32>
    %86 = tpu.matmul %83, %85, %cst_93 {dimension_numbers = #tpu.dot_dimension_numbers<[1], [0], [0], [1], [0, 0, 1, 1], [], []>} : vector<64x36xf32>, vector<36x128xf32>, vector<64x128xf32> -> vector<64x128xf32>
    %87 = arith.addf %81, %86 : vector<64x128xf32>
    %c0_94 = arith.constant 0 : index
    %c3_95 = arith.constant 3 : index
    %c16_96 = arith.constant 16 : index
    %c0_97 = arith.constant 0 : index
    %88 = vector.load %arg2[%c0_94, %c3_95, %c16_96, %c0_97] : memref<1x4x80x36xf32, #tpu.memory_space<vmem>>, vector<1x1x64x36xf32>
    %89 = vector.shape_cast %88 : vector<1x1x64x36xf32> to vector<64x36xf32>
    %c2_98 = arith.constant 2 : index
    %c0_99 = arith.constant 0 : index
    %c0_100 = arith.constant 0 : index
    %90 = vector.load %arg3[%c2_98, %c0_99, %c0_100] : memref<3x36x128xf32, #tpu.memory_space<vmem>>, vector<1x36x128xf32>
    %91 = vector.shape_cast %90 : vector<1x36x128xf32> to vector<36x128xf32>
    %cst_101 = arith.constant dense<0.000000e+00> : vector<64x128xf32>
    %92 = tpu.matmul %89, %91, %cst_101 {dimension_numbers = #tpu.dot_dimension_numbers<[1], [0], [0], [1], [0, 0, 1, 1], [], []>} : vector<64x36xf32>, vector<36x128xf32>, vector<64x128xf32> -> vector<64x128xf32>
    %93 = arith.addf %87, %92 : vector<64x128xf32>
    %94 = vector.broadcast %2 : vector<1x128xf32> to vector<64x128xf32>
    %95 = arith.addf %93, %94 : vector<64x128xf32>
    %c0_102 = arith.constant 0 : index
    %c192 = arith.constant 192 : index
    %c0_103 = arith.constant 0 : index
    %96 = vector.load %arg5[%c0_102, %c192, %c0_103] : memref<1x256x128xf32, #tpu.memory_space<vmem>>, vector<1x64x128xf32>
    %97 = vector.shape_cast %96 : vector<1x64x128xf32> to vector<64x128xf32>
    %98 = vector.shape_cast %95 : vector<64x128xf32> to vector<1x64x128xf32>
    tpu.vector_store %arg5[%c0_102, %c192, %c0_103], %98 {strides = array<i32>} : memref<1x256x128xf32, #tpu.memory_space<vmem>>, vector<1x64x128xf32>,
    return
  }
  func.func @transform_0(%arg0: i32, %arg1: i32) -> (i32, i32, i32, i32) {
    %c0_i32 = arith.constant 0 : i32
    %c0_i32_0 = arith.constant 0 : i32
    %c0_i32_1 = arith.constant 0 : i32
    %c0_i32_2 = arith.constant 0 : i32
    return %arg0, %c0_i32, %c0_i32_0, %c0_i32_1 : i32, i32, i32, i32
  }
  func.func @transform_1(%arg0: i32, %arg1: i32) -> (i32, i32, i32) {
    %c0_i32 = arith.constant 0 : i32
    %c0_i32_0 = arith.constant 0 : i32
    %c0_i32_1 = arith.constant 0 : i32
    return %c0_i32, %c0_i32_0, %arg1 : i32, i32, i32
  }
  func.func @transform_2(%arg0: i32, %arg1: i32) -> (i32, i32) {
    %c0_i32 = arith.constant 0 : i32
    %c0_i32_0 = arith.constant 0 : i32
    return %c0_i32, %arg1 : i32, i32
  }
  func.func @transform_3(%arg0: i32, %arg1: i32) -> (i32, i32, i32) {
    %c0_i32 = arith.constant 0 : i32
    %c0_i32_0 = arith.constant 0 : i32
    return %arg0, %c0_i32, %arg1 : i32, i32, i32
  }
}

</mosaic_0001>

<bundles_post_ra>
// kernel: tpu_custom_call.1
= control target key start
LH: loop header
LB: loop body
LE: loop exit
PB: predicated region body
PF: predicated region fallthrough
CT: control target
= control target key end

     0   :  { %8 = vsyncpa [#allocation3], 0  ;;  %s2238_s0 = inlined_call_operand.vmem [shape: f32[2,4,80,36], index: 0, kind: input, shape index: {}]   ;;  %s2239_s1 = inlined_call_operand.vmem [shape: f32[3,36,128], index: 1, kind: input, shape index: {}]   ;;  %s2240_s2 = inlined_call_operand.vmem [shape: f32[1,128], index: 2, kind: input, shape index: {}]   ;;  %s2241_s3 = inlined_call_operand.hbm [shape: f32[2,256,128], index: 3, kind: output, shape index: {}]  }
   0x1   :  { %10 = vsyncpa [#allocation3 + $0x1], 0  ;;  %s1672_s12 = smov 0   ;;  %s1674_s13 = smov 0  }
   0x2   :  { %s1676_s14 = smov 0   ;;  %s1678_s15 = smov 0  }
   0x3   :  { %s1680_s16 = smov 0   ;;  %s1682_s17 = smov 0  }
   0x4 LB: > { %s1297_s18 = sadd.s32 4294967295, %s1648_s17   ;;  %s1298_s19 = sadd.s32 4294967294, %s1648_s17   ;;  %s1648_s17 = sphi %s1682_s17, %s16_s17   ;;  %s1644_s16 = sphi %s1680_s16, %s2248_s16   ;;  %s1640_s15 = sphi %s1678_s15, %s2247_s15   ;;  %s1636_s14 = sphi %s1676_s14, %s2246_s14   ;;  %s1632_s13 = sphi %s1674_s13, %s2245_s13   ;;  %s1628_s12 = sphi %s1672_s12, %s2244_s12  }
   0x5   : > { %s28_s20 = sadd.s32 1, %s1644_s16  ;;  %s115_s21 = sadd.s32 1, %s1636_s14 }
   0x6   : > { %p30_p0 = scmp.ge.s32.totalorder %s28_s20, 2  ;;  %p125_p1 = scmp.ne.s32.totalorder %s1636_s14, %s1632_s13 }
   0x7   : > { %p126_p2 = scmp.eq.s32.totalorder %s1297_s18, 1  ;;  %p131_p3 = scmp.ne.s32.totalorder %s1632_s13, %s1628_s12 }
   0x8   : > { %s2250_s20 = smov (%p30_p0, %s28_s20), 0  ;;  %p132_p5 = scmp.eq.s32.totalorder %s1298_s19, 1 }
   0x9   : > { %p1712_p4 = por %p126_p2, %p125_p1  ;;  %s110_s23 = ssub.s32 %s1644_s16, %s2250_s20 }
   0xa   : > { %p1303_p6 = scmp.ge.s32.totalorder %s1648_s17, 1  ;;  %p113_p7 = scmp.eq.s32.totalorder %s110_s23, 0 }
   0xb   : > { %p1719_p8 = por %p132_p5, %p131_p3  ;;  %p171_p9 = scmp.lt.s32.totalorder %s1648_s17, 3 }
   0xc   : > { %s1725_s25 = scalar_select %p113_p7, %s1636_s14, %s115_s21  }
   0xd   : > { %p172_p10 = pnand %p1303_p6, %p171_p9 }
   0xe   : > { %p202_p11 = scmp.lt.s32.totalorder (!%p172_p10), %s1640_s15, 1  ;;  %s1590_s27 = scalar_lea.hbm (!%p172_p10), %s2241_s3, 512 }
   0xf   : > { %175 = sbr.rel (%p172_p10) target bundleno = 357 (0x165), region = 32 }
  0x14   : > { %v1310_v0 = vld [vmem:[%s2239_s1 + $0x48] sm:$0xf]  ;;  %vm260_vm0 = vcmask 1043456   ;;  %v1333_v1 = vld [vmem:[%s2239_s1 + $0x70] sm:$0xf]  ;;  %v1736_v2 = vld [vmem:[%s2239_s1 + $0x40] sm:$0xff] }
  0x15   : > { %1311 = vmatpush.msk.msra.mxu0 %vm260_vm0, %v1310_v0  ;;  %1334 = vmatpush.msk.msra.mxu2 %vm260_vm0, %v1333_v1  ;;  %v1356_v3 = vld [vmem:[%s2239_s1 + $0x48] sm:$0xf]  ;;  %v227_v4 = vld [vmem:[%s2239_s1 + $0x20] sm:$0xf]  ;;  %v1757_v6 = vld [vmem:[%s2239_s1 + $0x38] sm:$0xff]  ;;  %s203_s29 = scalar_select %p202_p11, %s1640_s15, 1 }
  0x16   : > { %v1749_v5 = vld [vmem:[%s2239_s1 + $0x68] sm:$0xff]  ;;  %1357 = vmatpush.msk.msra.mxu3 %vm260_vm0, %v1356_v3  ;;  %1320 = vmatpush.msk.msra.mxu1 %vm260_vm0, %v227_v4  ;;  %v1762_v7 = vld [vmem:[%s2239_s1 + $0x18] sm:$0xff]  ;;  %v1767_v8 = vld [vmem:[%s2239_s1 + $0x60] sm:$0xff]  ;;  %vm235_vm1 = vcmask 293888  }
  0x17   : > { %276 = vmatpush.msra.mxu0 %v1736_v2  ;;  %405 = vmatpush.msra.mxu2 %v1749_v5  ;;  %v1774_v9 = vld [vmem:[%s2239_s1 + $0x10] sm:$0xff]  ;;  %v1787_v11 = vld [vmem:[%s2239_s1 + $0x58] sm:$0xff]  ;;  %v1794_v12 = vld [vmem:[%s2239_s1 + $0x8] sm:$0xff]  ;;  %s1511_s9 = smul.u32 320, %s203_s29  ;;  %s199_s29 = sand.u32 1, %s1632_s13  }
  0x18   : > { %520 = vmatpush.msra.mxu3 %v1736_v2  ;;  %323 = vmatpush.msra.mxu1 %v1762_v7  ;;  %v1782_v10 = vld [vmem:[%s2239_s1 + $0x30] sm:$0xff]  ;;  %v1801_v13 = vld [vmem:[%s2239_s1 + $0x28] sm:$0xff]  ;;  %v1830_v19 = vld [vmem:[%s2239_s1] sm:$0xff]  ;;  %s1304_s30 = sshll.u32 %s199_s29, 8 }
  0x19   : > { %277 = vmatpush.msra.mxu0 %v1757_v6  ;;  %406 = vmatpush.msra.mxu2 %v1767_v8  ;;  %v1806_v14 = vld [vmem:[%s2239_s1 + $0x50] sm:$0xff]  ;;  %s1813_s26 = scalar_lea.vmem %s2238_s0, %s1511_s9  ;;  %v1410_v18 = vld [vmem:[%s2239_s1 + $0x48] sm:$0xf]  ;;  %v714_v21 = vld [vmem:[%s2239_s1 + $0x20] sm:$0xf]  ;;  %s2047_s6 = scalar_lea.vmem [#allocation2], %s1304_s30 }
  0x1a   : > { %521 = vmatpush.msra.mxu3 %v1757_v6  ;;  %324 = vmatpush.msra.mxu1 %v1774_v9  ;;  %v216_v15 = vld [vmem:[%s1813_s26 + $0x8] sm:$0xff]  ;;  %v352_v16 = vld [vmem:[%s1813_s26 + $0x10] sm:$0xff]  ;;  %v1820_v17 = vld [vmem:[%s1813_s26 + $0x58] sm:$0xff]  ;;  %s1195_s10 = sshll.u32 %s2047_s6, 4  ;;  %s1196_s10 = int_to_ptr.vmem [resolvable:$true] %s1195_s10 }
  0x1b   : > { %278 = vmatpush.msra.mxu0 %v1782_v10  ;;  %407 = vmatpush.msra.mxu2 %v1787_v11  ;;  %v215_v20 = vld [vmem:[%s1813_s26] sm:$0xff]  ;;  %v1387_v22 = vld [vmem:[%s2239_s1 + $0x70] sm:$0xf]  ;;  %v353_v24 = vld [vmem:[%s1813_s26 + $0x18] sm:$0xff] }
  0x1c   : > { %522 = vmatpush.msra.mxu3 %v1782_v10  ;;  %325 = vmatpush.msra.mxu1 %v1794_v12  ;;  %v474_v23 = vld [vmem:[%s2239_s1 + $0x20] sm:$0xf]  ;;  %v1878_v27 = vld [vmem:[%s1813_s26 + $0x68] sm:$0xff]  ;;  %v1889_v29 = vld [vmem:[%s1813_s26 + $0x70] sm:$0xff] }
  0x1d   : > { %279 = vmatpush.msra.mxu0 %v1801_v13  ;;  %408 = vmatpush.msra.mxu2 %v1806_v14  ;;  %v1857_v25 = vld [vmem:[%s1813_s26 + $0x60] sm:$0xff]  ;;  %v355_v28 = vld [vmem:[%s1813_s26 + $0x28] sm:$0xff]  ;;  %v356_v30 = vld [vmem:[%s1813_s26 + $0x30] sm:$0xff] }
  0x1e   : > { %523 = vmatpush.msra.mxu3 %v1801_v13  ;;  %1312 = vmatmul.msk.f32.vlgmr.msra.gmra.mxu0 %vm235_vm1, %v216_v15  ;;  %v354_v26 = vld [vmem:[%s1813_s26 + $0x20] sm:$0xff]  ;;  %v1898_v31 = vld [vmem:[%s1813_s26 + $0x78] sm:$0xff]  ;;  %v1495_v33 = vld [vmem:[%s2239_s1 + $0x70] sm:$0xf] }
  0x1f   : > { %1335 = vmatmul.msk.f32.vlgmr.msra.gmra.mxu2 %vm235_vm1, %v352_v16  ;;  %1358 = vmatmul.msk.f32.vlgmr.msra.gmra.mxu3 %vm235_vm1, %v1820_v17  ;;  %v954_v32 = vld [vmem:[%s2239_s1 + $0x20] sm:$0xf]  ;;  %v1464_v34 = vld [vmem:[%s2239_s1 + $0x48] sm:$0xf]  ;;  %v357_v35 = vld [vmem:[%s1813_s26 + $0x38] sm:$0xff] }
  0x20   : > { %1411 = vmatpush.msk.msrb.mxu2 %vm260_vm0, %v1410_v18  ;;  %326 = vmatpush.msra.mxu1 %v1830_v19  ;;  %v1920_v36 = vld [vmem:[%s1813_s26 + $0x80] sm:$0xff]  ;;  %v1441_v37 = vld [vmem:[%s2239_s1 + $0x70] sm:$0xf]  ;;  %v1350_v39 = vld [vmem:[%s1813_s26 + $0x88] sm:$0xff] }
  0x21   : > { %1321 = vmatmul.msk.f32.vlgmr.msra.gmra.mxu1 %vm235_vm1, %v215_v20  ;;  %1420 = vmatpush.msk.msrb.mxu3 %vm260_vm0, %v714_v21  ;;  %v358_v38 = vld [vmem:[%s1813_s26 + $0x40] sm:$0xff]  ;;  %v359_v40 = vld [vmem:[%s1813_s26 + $0x48] sm:$0xff]  ;;  %v1351_v41 = vld [vmem:[%s1813_s26 + $0x90] sm:$0xff] }
  0x22   : > { %1388 = vmatpush.msk.msrb.mxu1 %vm260_vm0, %v1387_v22  ;;  %1366 = vmatpush.msk.msrb.mxu0 %vm260_vm0, %v474_v23  ;;  %v1343_v42 = vld [vmem:[%s1813_s26 + $0x50] sm:$0xff]  ;;  %v1398_v43 = vld [vmem:[%s1813_s26 + $0xa8] sm:$0xff]  ;;  %v1397_v44 = vld [vmem:[%s1813_s26 + $0xa0] sm:$0xff] }
  0x23   : > { %760 = vmatpush.msrb.mxu2 %v1736_v2  ;;  %807 = vmatpush.msrb.mxu3 %v1762_v7  ;;  %v1399_v45 = vld [vmem:[%s1813_s26 + $0xb0] sm:$0xff]  ;;  %v1400_v46 = vld [vmem:[%s1813_s26 + $0xb8] sm:$0xff]  ;;  %v1401_v47 = vld [vmem:[%s1813_s26 + $0xc0] sm:$0xff] }
  0x24   : > { %648 = vmatpush.msrb.mxu1 %v1749_v5  ;;  %567 = vmatpush.msrb.mxu0 %v1762_v7  ;;  %v1988_v48 = vld [vmem:[%s1813_s26 + $0xc8] sm:$0xff]  ;;  %v1998_v49 = vld [vmem:[%s1813_s26 + $0xd0] sm:$0xff]  ;;  %v2008_v50 = vld [vmem:[%s1813_s26 + $0xd8] sm:$0xff] }
  0x25   : > { %761 = vmatpush.msrb.mxu2 %v1757_v6  ;;  %808 = vmatpush.msrb.mxu3 %v1774_v9  ;;  %v2018_v51 = vld [vmem:[%s1813_s26 + $0xe0] sm:$0xff]  ;;  %v1382_v52 = vld [vmem:[%s1813_s26 + $0x98] sm:$0xff]  ;;  %v1451_v54 = vld [vmem:[%s1813_s26 + $0xf0] sm:$0xff] }
  0x26   : > { %1313 = vmatmul.msk.f32.gmra.mxu0 %vm235_vm1, %v352_v16  ;;  %649 = vmatpush.msrb.mxu1 %v1767_v8  ;;  %v1483_v55 = vld [vmem:[%s1813_s26 + $0x100] sm:$0xff]  ;;  %v1452_v57 = vld [vmem:[%s1813_s26 + $0xf8] sm:$0xff]  ;;  %v1484_v0 = vld [vmem:[%s1813_s26 + $0x108] sm:$0xff] }
  0x27   : > { %1336 = vmatmul.msk.f32.gmra.mxu2 %vm235_vm1, %v353_v24  ;;  %1359 = vmatmul.msk.f32.gmra.mxu3 %vm235_vm1, %v1857_v25  ;;  %v2039_v59 = vld [vmem:[%s2240_s2] ss:$0 sm:$0xff] }
  0x28   : > { %568 = vmatpush.msrb.mxu0 %v1774_v9  ;;  %762 = vmatpush.msrb.mxu2 %v1782_v10 }
  0x29   : > { %1322 = vmatmul.msk.f32.gmra.mxu1 %vm235_vm1, %v216_v15  ;;  %809 = vmatpush.msrb.mxu3 %v1794_v12 }
  0x2a   : > { %650 = vmatpush.msrb.mxu1 %v1787_v11  ;;  %569 = vmatpush.msrb.mxu0 %v1794_v12 }
  0x2b   : > { %763 = vmatpush.msrb.mxu2 %v1801_v13  ;;  %810 = vmatpush.msrb.mxu3 %v1830_v19 }
  0x2c   : > { %651 = vmatpush.msrb.mxu1 %v1806_v14  ;;  %570 = vmatpush.msrb.mxu0 %v1830_v19 }
  0x2d   : > { %1474 = vmatpush.msk.msra.mxu2 %vm260_vm0, %v954_v32  ;;  %1496 = vmatpush.msk.msra.mxu3 %vm260_vm0, %v1495_v33  ;;  %v1488_v32 = vld [vmem:[%s1813_s26 + $0x128] sm:$0xff] }
  0x2e   : > { %1314 = vmatmul.msk.f32.gmra.mxu0 %vm235_vm1, %v353_v24  ;;  %1465 = vmatpush.msk.msra.mxu1 %vm260_vm0, %v1464_v34 }
  0x2f   : > { %1337 = vmatmul.msk.f32.gmra.mxu2 %vm235_vm1, %v354_v26  ;;  %1360 = vmatmul.msk.f32.gmra.mxu3 %vm235_vm1, %v1878_v27 }
  0x30   : > { %1047 = vmatpush.msra.mxu2 %v1762_v7  ;;  %1128 = vmatpush.msra.mxu3 %v1749_v5 }
  0x31   : > { %1323 = vmatmul.msk.f32.gmra.mxu1 %vm235_vm1, %v352_v16  ;;  %1442 = vmatpush.msk.msra.mxu0 %vm260_vm0, %v1441_v37  ;;  %v1486_v16 = vld [vmem:[%s1813_s26 + $0x118] sm:$0xff] }
  0x32   : > { %1000 = vmatpush.msra.mxu1 %v1736_v2  ;;  %1048 = vmatpush.msra.mxu2 %v1774_v9 }
  0x33   : > { %1129 = vmatpush.msra.mxu3 %v1767_v8  ;;  %888 = vmatpush.msra.mxu0 %v1749_v5 }
  0x34   : > { %1001 = vmatpush.msra.mxu1 %v1757_v6  ;;  %1049 = vmatpush.msra.mxu2 %v1794_v12 }
  0x35   : > { %1130 = vmatpush.msra.mxu3 %v1787_v11  ;;  %889 = vmatpush.msra.mxu0 %v1767_v8  ;;  %v1485_v8 = vld [vmem:[%s1813_s26 + $0x110] sm:$0xff] }
  0x36   : > { %1315 = vmatmul.msk.f32.gmra.mxu0 %vm235_vm1, %v354_v26  ;;  %1002 = vmatpush.msra.mxu1 %v1782_v10 }
  0x37   : > { %1338 = vmatmul.msk.f32.gmra.mxu2 %vm235_vm1, %v355_v28  ;;  %1361 = vmatmul.msk.f32.gmra.mxu3 %vm235_vm1, %v1889_v29 }
  0x38   : > { %1050 = vmatpush.msra.mxu2 %v1830_v19  ;;  %1131 = vmatpush.msra.mxu3 %v1806_v14 }
  0x39   : > { %1324 = vmatmul.msk.f32.gmra.mxu1 %vm235_vm1, %v353_v24  ;;  %890 = vmatpush.msra.mxu0 %v1787_v11  ;;  %v1487_v24 = vld [vmem:[%s1813_s26 + $0x120] sm:$0xff] }
  0x3a   : > { %1003 = vmatpush.msra.mxu1 %v1801_v13 }
  0x3b   : > { %891 = vmatpush.msra.mxu0 %v1806_v14 }
  0x3e   : > { %1316 = vmatmul.msk.f32.gmra.mxu0 %vm235_vm1, %v355_v28 }
  0x3f   : > { %1339 = vmatmul.msk.f32.gmra.mxu2 %vm235_vm1, %v356_v30  ;;  %1362 = vmatmul.msk.f32.gmra.mxu3 %vm235_vm1, %v1898_v31 }
  0x41   : > { %1325 = vmatmul.msk.f32.gmra.mxu1 %vm235_vm1, %v354_v26 }
  0x46   : > { %1317 = vmatmul.msk.f32.gmra.mxu0 %vm235_vm1, %v356_v30 }
  0x47   : > { %1340 = vmatmul.msk.f32.gmra.mxu2 %vm235_vm1, %v357_v35  ;;  %1363 = vmatmul.msk.f32.gmra.mxu3 %vm235_vm1, %v1920_v36 }
  0x49   : > { %1326 = vmatmul.msk.f32.gmra.mxu1 %vm235_vm1, %v355_v28 }
  0x4e   : > { %1318 = vmatmul.msk.f32.gmra.mxu0 %vm235_vm1, %v357_v35 }
  0x4f   : > { %1341 = vmatmul.msk.f32.gmra.mxu2 %vm235_vm1, %v358_v38  ;;  %1364 = vmatmul.msk.f32.gmra.mxu3 %vm235_vm1, %v1350_v39 }
  0x51   : > { %1327 = vmatmul.msk.f32.gmra.mxu1 %vm235_vm1, %v356_v30 }
  0x56   : > { %1319 = vmatmul.msk.f32.gmra.mxu0 %vm235_vm1, %v358_v38 }
  0x57   : > { %1342 = vmatmul.msk.f32.gmra.mxu2 %vm235_vm1, %v359_v40  ;;  %1365 = vmatmul.msk.f32.gmra.mxu3 %vm235_vm1, %v1351_v41  ;;  %v1489_v40 = vld [vmem:[%s1813_s26 + $0x130] sm:$0xff] }
  0x59   : > { %1328 = vmatmul.msk.f32.gmra.mxu1 %vm235_vm1, %v357_v35 }
  0x5e   : > { %1367 = vmatmul.msk.f32.vlgmr.msrb.gmra.mxu0 %vm235_vm1, %v1343_v42 }
  0x5f   : > { %1412 = vmatmul.msk.f32.vlgmr.msrb.gmra.mxu2 %vm235_vm1, %v1398_v43  ;;  %1421 = vmatmul.msk.f32.vlgmr.msrb.gmra.mxu3 %vm235_vm1, %v1397_v44 }
  0x61   : > { %1389 = vmatmul.msk.f32.vlgmr.msrb.gmra.mxu1 %vm235_vm1, %v1857_v25 }
  0x66   : > { %1368 = vmatmul.msk.f32.gmra.mxu0 %vm235_vm1, %v1820_v17 }
  0x67   : > { %1413 = vmatmul.msk.f32.gmra.mxu2 %vm235_vm1, %v1399_v45  ;;  %1422 = vmatmul.msk.f32.gmra.mxu3 %vm235_vm1, %v1398_v43 }
  0x69   : > { %1390 = vmatmul.msk.f32.gmra.mxu1 %vm235_vm1, %v1878_v27 }
  0x6e   : > { %1369 = vmatmul.msk.f32.gmra.mxu0 %vm235_vm1, %v1857_v25 }
  0x6f   : > { %1414 = vmatmul.msk.f32.gmra.mxu2 %vm235_vm1, %v1400_v46  ;;  %1423 = vmatmul.msk.f32.gmra.mxu3 %vm235_vm1, %v1399_v45 }
  0x71   : > { %1391 = vmatmul.msk.f32.gmra.mxu1 %vm235_vm1, %v1889_v29 }
  0x76   : > { %1370 = vmatmul.msk.f32.gmra.mxu0 %vm235_vm1, %v1878_v27 }
  0x77   : > { %1415 = vmatmul.msk.f32.gmra.mxu2 %vm235_vm1, %v1401_v47  ;;  %1424 = vmatmul.msk.f32.gmra.mxu3 %vm235_vm1, %v1400_v46 }
  0x79   : > { %1392 = vmatmul.msk.f32.gmra.mxu1 %vm235_vm1, %v1898_v31 }
  0x7e   : > { %1371 = vmatmul.msk.f32.gmra.mxu0 %vm235_vm1, %v1889_v29 }
  0x7f   : > { %1416 = vmatmul.msk.f32.gmra.mxu2 %vm235_vm1, %v1988_v48  ;;  %1425 = vmatmul.msk.f32.gmra.mxu3 %vm235_vm1, %v1401_v47 }
  0x81   : > { %1393 = vmatmul.msk.f32.gmra.mxu1 %vm235_vm1, %v1920_v36 }
  0x86   : > { %1372 = vmatmul.msk.f32.gmra.mxu0 %vm235_vm1, %v1898_v31 }
  0x87   : > { %1417 = vmatmul.msk.f32.gmra.mxu2 %vm235_vm1, %v1998_v49  ;;  %1426 = vmatmul.msk.f32.gmra.mxu3 %vm235_vm1, %v1988_v48 }
  0x89   : > { %1394 = vmatmul.msk.f32.gmra.mxu1 %vm235_vm1, %v1350_v39 }
  0x8e   : > { %1373 = vmatmul.msk.f32.gmra.mxu0 %vm235_vm1, %v1920_v36 }
  0x8f   : > { %1418 = vmatmul.msk.f32.gmra.mxu2 %vm235_vm1, %v2008_v50  ;;  %1427 = vmatmul.msk.f32.gmra.mxu3 %vm235_vm1, %v1998_v49 }
  0x91   : > { %1395 = vmatmul.msk.f32.gmra.mxu1 %vm235_vm1, %v1351_v41 }
  0x96   : > { %1374 = vmatmul.msk.f32.gmra.mxu0 %vm235_vm1, %v1350_v39 }
  0x97   : > { %1419 = vmatmul.msk.f32.gmra.mxu2 %vm235_vm1, %v2018_v51  ;;  %1428 = vmatmul.msk.f32.gmra.mxu3 %vm235_vm1, %v2008_v50 }
  0x99   : > { %1396 = vmatmul.msk.f32.gmra.mxu1 %vm235_vm1, %v1382_v52 }
  0x9b   : > { %v281_v53 = vpop.f32.mrf.mxu0 }
  0x9e   : > { %v328_v56 = vpop.f32.mrf.mxu1  ;;  %1443 = vmatmul.msk.f32.vlgmr.msra.gmra.mxu0 %vm235_vm1, %v1399_v45 }
  0x9f   : > { %v329_v58 = vadd.f32 %v328_v56, %v281_v53  ;;  %1475 = vmatmul.msk.f32.vlgmr.msra.gmra.mxu2 %vm235_vm1, %v1451_v54  ;;  %1497 = vmatmul.msk.f32.vlgmr.msra.gmra.mxu3 %vm235_vm1, %v1483_v55 }
  0xa1   : > { %1466 = vmatmul.msk.f32.vlgmr.msra.gmra.mxu1 %vm235_vm1, %v1452_v57 }
  0xa2   : > { %v410_v60 = vpop.f32.mrf.mxu2  ;;  %v2042_v61 = vpop.f32.mrf.mxu3 }
  0xa3   : > { %v434_v62 = vadd.f32 %v410_v60, %v329_v58  ;;  %v284_v63 = vpop.f32.mrf.mxu0 }
  0xa5   : > { %v445_v1 = vadd.f32 %v2039_v59, %v434_v62 }
  0xa6   : > { %v331_v2 = vpop.f32.mrf.mxu1  ;;  %1444 = vmatmul.msk.f32.gmra.mxu0 %vm235_vm1, %v1400_v46 }
  0xa7   : > { %453 = vst [vmem:[%s2047_s6] sm:$0xff] %v445_v1  ;;  %v332_v3 = vadd.f32 %v331_v2, %v284_v63  ;;  %1476 = vmatmul.msk.f32.gmra.mxu2 %vm235_vm1, %v1452_v57  ;;  %1498 = vmatmul.msk.f32.gmra.mxu3 %vm235_vm1, %v1484_v0 }
  0xa9   : > { %1467 = vmatmul.msk.f32.gmra.mxu1 %vm235_vm1, %v1483_v55 }
  0xaa   : > { %v413_v4 = vpop.f32.mrf.mxu2  ;;  %v2053_v5 = vpop.f32.mrf.mxu3 }
  0xab   : > { %v435_v6 = vadd.f32 %v413_v4, %v332_v3  ;;  %v287_v7 = vpop.f32.mrf.mxu0 }
  0xad   : > { %v446_v9 = vadd.f32 %v2039_v59, %v435_v6 }
  0xae   : > { %v334_v10 = vpop.f32.mrf.mxu1  ;;  %1445 = vmatmul.msk.f32.gmra.mxu0 %vm235_vm1, %v1401_v47 }
  0xaf   : > { %454 = vst [vmem:[%s2047_s6 + $0x8] sm:$0xff] %v446_v9  ;;  %v335_v11 = vadd.f32 %v334_v10, %v287_v7  ;;  %1477 = vmatmul.msk.f32.gmra.mxu2 %vm235_vm1, %v1483_v55  ;;  %1499 = vmatmul.msk.f32.gmra.mxu3 %vm235_vm1, %v1485_v8 }
  0xb1   : > { %1468 = vmatmul.msk.f32.gmra.mxu1 %vm235_vm1, %v1484_v0 }
  0xb2   : > { %v416_v12 = vpop.f32.mrf.mxu2  ;;  %v2062_v13 = vpop.f32.mrf.mxu3 }
  0xb3   : > { %v436_v14 = vadd.f32 %v416_v12, %v335_v11  ;;  %v290_v15 = vpop.f32.mrf.mxu0 }
  0xb5   : > { %v447_v17 = vadd.f32 %v2039_v59, %v436_v14 }
  0xb6   : > { %v337_v18 = vpop.f32.mrf.mxu1  ;;  %1446 = vmatmul.msk.f32.gmra.mxu0 %vm235_vm1, %v1988_v48  ;;  %v1436_v48 = vld [vmem:[%s1813_s26 + $0xe8] sm:$0xff] }
  0xb7   : > { %455 = vst [vmem:[%s2047_s6 + $0x10] sm:$0xff] %v447_v17  ;;  %v338_v19 = vadd.f32 %v337_v18, %v290_v15  ;;  %1478 = vmatmul.msk.f32.gmra.mxu2 %vm235_vm1, %v1484_v0  ;;  %1500 = vmatmul.msk.f32.gmra.mxu3 %vm235_vm1, %v1486_v16 }
  0xb9   : > { %1469 = vmatmul.msk.f32.gmra.mxu1 %vm235_vm1, %v1485_v8 }
  0xba   : > { %v419_v20 = vpop.f32.mrf.mxu2  ;;  %v2072_v21 = vpop.f32.mrf.mxu3 }
  0xbb   : > { %v437_v22 = vadd.f32 %v419_v20, %v338_v19  ;;  %v293_v23 = vpop.f32.mrf.mxu0 }
  0xbd   : > { %v448_v25 = vadd.f32 %v2039_v59, %v437_v22 }
  0xbe   : > { %v340_v26 = vpop.f32.mrf.mxu1  ;;  %1447 = vmatmul.msk.f32.gmra.mxu0 %vm235_vm1, %v1998_v49  ;;  %v1490_v49 = vld [vmem:[%s1813_s26 + $0x138] sm:$0xff]  ;;  %s1510_s26 = sshll.u32 %s1640_s15, 8  ;;  %s1182_s15 = scalar_lea.sflag [#allocation3], %s199_s29 }
  0xbf   : > { %456 = vst [vmem:[%s2047_s6 + $0x18] sm:$0xff] %v448_v25  ;;  %v341_v27 = vadd.f32 %v340_v26, %v293_v23  ;;  %1479 = vmatmul.msk.f32.gmra.mxu2 %vm235_vm1, %v1485_v8  ;;  %1501 = vmatmul.msk.f32.gmra.mxu3 %vm235_vm1, %v1487_v24  ;;  %s1194_s9 = scalar_lea.hbm %s2241_s3, %s1510_s26 }
  0xc0   : > { %s1197_s11 = sshll.u32 %s1194_s9, 4  ;;  %s1198_s11 = int_to_ptr.hbm [resolvable:$true] %s1197_s11 }
  0xc1   : > { %1470 = vmatmul.msk.f32.gmra.mxu1 %vm235_vm1, %v1486_v16  ;;  %s1584_s18 = sshra.s32 %s1198_s11, 4  ;;  %s1585_s18 = int_to_ptr.hbm [resolvable:$true] %s1584_s18 }
  0xc2   : > { %v422_v28 = vpop.f32.mrf.mxu2  ;;  %v2082_v29 = vpop.f32.mrf.mxu3  ;;  %s1586_s19 = scalar_lea.hbm %s1585_s18, 256  ;;  %p1591_p1 = scmp.lt.s32.totalorder %s1585_s18, %s2241_s3 }
  0xc3   : > { %v438_v30 = vadd.f32 %v422_v28, %v341_v27  ;;  %v296_v31 = vpop.f32.mrf.mxu0  ;;  %p1587_p12 = scmp.ne.s32.totalorder %s1585_s18, %s1586_s19  ;;  %p1592_p2 = scmp.lt.s32.totalorder %s1590_s27, %s1586_s19 }
  0xc5   : > { %v449_v33 = vadd.f32 %v2039_v59, %v438_v30  ;;  %p1588_p13 = pnand %p1587_p12, %p1712_p4  ;;  %p1593_p3 = por %p1592_p2, %p1591_p1 }
  0xc6   : > { %v343_v34 = vpop.f32.mrf.mxu1  ;;  %1448 = vmatmul.msk.f32.gmra.mxu0 %vm235_vm1, %v2008_v50 }
  0xc7   : > { %457 = vst [vmem:[%s2047_s6 + $0x20] sm:$0xff] %v449_v33  ;;  %v344_v35 = vadd.f32 %v343_v34, %v296_v31  ;;  %1480 = vmatmul.msk.f32.gmra.mxu2 %vm235_vm1, %v1486_v16  ;;  %1502 = vmatmul.msk.f32.gmra.mxu3 %vm235_vm1, %v1488_v32  ;;  %p1589_p0 = pneg %p1588_p13 }
  0xc9   : > { %1471 = vmatmul.msk.f32.gmra.mxu1 %vm235_vm1, %v1487_v24  ;;  %p1594_p5 = pnand %p1593_p3, %p1589_p0 }
  0xca   : > { %v425_v36 = vpop.f32.mrf.mxu2  ;;  %v2092_v37 = vpop.f32.mrf.mxu3 }
  0xcb   : > { %v439_v38 = vadd.f32 %v425_v36, %v344_v35  ;;  %v299_v39 = vpop.f32.mrf.mxu0 }
  0xcd   : > { %v450_v41 = vadd.f32 %v2039_v59, %v439_v38 }
  0xce   : > { %v346_v42 = vpop.f32.mrf.mxu1  ;;  %1449 = vmatmul.msk.f32.gmra.mxu0 %vm235_vm1, %v2018_v51 }
  0xcf   : > { %458 = vst [vmem:[%s2047_s6 + $0x28] sm:$0xff] %v450_v41  ;;  %v347_v43 = vadd.f32 %v346_v42, %v299_v39  ;;  %1481 = vmatmul.msk.f32.gmra.mxu2 %vm235_vm1, %v1487_v24  ;;  %1503 = vmatmul.msk.f32.gmra.mxu3 %vm235_vm1, %v1489_v40 }
  0xd1   : > { %1472 = vmatmul.msk.f32.gmra.mxu1 %vm235_vm1, %v1488_v32 }
  0xd2   : > { %v428_v44 = vpop.f32.mrf.mxu2  ;;  %v2102_v45 = vpop.f32.mrf.mxu3 }
  0xd3   : > { %v440_v46 = vadd.f32 %v428_v44, %v347_v43  ;;  %v302_v47 = vpop.f32.mrf.mxu0 }
  0xd5   : > { %v451_v50 = vadd.f32 %v2039_v59, %v440_v46 }
  0xd6   : > { %v349_v52 = vpop.f32.mrf.mxu1  ;;  %1450 = vmatmul.msk.f32.gmra.mxu0 %vm235_vm1, %v1436_v48 }
  0xd7   : > { %459 = vst [vmem:[%s2047_s6 + $0x30] sm:$0xff] %v451_v50  ;;  %v350_v51 = vadd.f32 %v349_v52, %v302_v47  ;;  %1482 = vmatmul.msk.f32.gmra.mxu2 %vm235_vm1, %v1488_v32  ;;  %1504 = vmatmul.msk.f32.gmra.mxu3 %vm235_vm1, %v1490_v49 }
  0xd9   : > { %1473 = vmatmul.msk.f32.gmra.mxu1 %vm235_vm1, %v1489_v40 }
  0xda   : > { %v431_v53 = vpop.f32.mrf.mxu2  ;;  %v546_v54 = vpop.f32.mrf.mxu3 }
  0xdb   : > { %v441_v55 = vadd.f32 %v431_v53, %v350_v51  ;;  %v572_v56 = vpop.f32.mrf.mxu0 }
  0xdc   : > { %v573_v57 = vadd.f32 %v572_v56, %v2042_v61 }
  0xdd   : > { %v452_v58 = vadd.f32 %v2039_v59, %v441_v55 }
  0xde   : > { %v653_v60 = vpop.f32.mrf.mxu1 }
  0xdf   : > { %460 = vst [vmem:[%s2047_s6 + $0x38] sm:$0xff] %v452_v58  ;;  %v677_v62 = vadd.f32 %v653_v60, %v573_v57 }
  0xe1   : > { %v685_v63 = vadd.f32 %v2039_v59, %v677_v62 }
  0xe2   : > { %v765_v0 = vpop.f32.mrf.mxu2  ;;  %v812_v1 = vpop.f32.mrf.mxu3 }
  0xe3   : > { %693 = vst [vmem:[%s2047_s6 + $0x40] sm:$0xff] %v685_v63  ;;  %v575_v2 = vpop.f32.mrf.mxu0  ;;  %v813_v49 = vadd.f32 %v812_v1, %v765_v0 }
  0xe4   : > { %v576_v3 = vadd.f32 %v575_v2, %v2053_v5 }
  0xe6   : > { %v656_v4 = vpop.f32.mrf.mxu1 }
  0xe7   : > { %v678_v6 = vadd.f32 %v656_v4, %v576_v3 }
  0xe9   : > { %v686_v7 = vadd.f32 %v2039_v59, %v678_v6 }
  0xea   : > { %v768_v61 = vpop.f32.mrf.mxu2  ;;  %v815_v8 = vpop.f32.mrf.mxu3 }
  0xeb   : > { %694 = vst [vmem:[%s2047_s6 + $0x48] sm:$0xff] %v686_v7  ;;  %v578_v9 = vpop.f32.mrf.mxu0  ;;  %v816_v56 = vadd.f32 %v815_v8, %v768_v61 }
  0xec   : > { %v579_v10 = vadd.f32 %v578_v9, %v2062_v13 }
  0xee   : > { %v659_v11 = vpop.f32.mrf.mxu1 }
  0xef   : > { %v679_v12 = vadd.f32 %v659_v11, %v579_v10 }
  0xf1   : > { %v687_v14 = vadd.f32 %v2039_v59, %v679_v12 }
  0xf2   : > { %v771_v15 = vpop.f32.mrf.mxu2  ;;  %v818_v16 = vpop.f32.mrf.mxu3 }
  0xf3   : > { %695 = vst [vmem:[%s2047_s6 + $0x50] sm:$0xff] %v687_v14  ;;  %v581_v5 = vpop.f32.mrf.mxu0  ;;  %v819_v3 = vadd.f32 %v818_v16, %v771_v15 }
  0xf4   : > { %v582_v17 = vadd.f32 %v581_v5, %v2072_v21 }
  0xf6   : > { %v662_v18 = vpop.f32.mrf.mxu1 }
  0xf7   : > { %v680_v19 = vadd.f32 %v662_v18, %v582_v17 }
  0xf9   : > { %v688_v20 = vadd.f32 %v2039_v59, %v680_v19 }
  0xfa   : > { %v2125_v22 = vpop.f32.mrf.mxu2  ;;  %v2127_v23 = vpop.f32.mrf.mxu3 }
  0xfb   : > { %696 = vst [vmem:[%s2047_s6 + $0x58] sm:$0xff] %v688_v20  ;;  %v584_v13 = vpop.f32.mrf.mxu0  ;;  %v822_v14 = vadd.f32 %v2127_v23, %v2125_v22 }
  0xfc   : > { %v585_v24 = vadd.f32 %v584_v13, %v2082_v29 }
  0xfe   : > { %v665_v25 = vpop.f32.mrf.mxu1 }
  0xff   : > { %v681_v26 = vadd.f32 %v665_v25, %v585_v24 }
 0x101   : > { %v689_v27 = vadd.f32 %v2039_v59, %v681_v26 }
 0x102   : > { %v2132_v28 = vpop.f32.mrf.mxu2  ;;  %v2134_v21 = vpop.f32.mrf.mxu3 }
 0x103   : > { %697 = vst [vmem:[%s2047_s6 + $0x60] sm:$0xff] %v689_v27  ;;  %v587_v30 = vpop.f32.mrf.mxu0  ;;  %v825_v25 = vadd.f32 %v2134_v21, %v2132_v28 }
 0x104   : > { %v588_v31 = vadd.f32 %v587_v30, %v2092_v37 }
 0x106   : > { %v668_v32 = vpop.f32.mrf.mxu1 }
 0x107   : > { %v682_v33 = vadd.f32 %v668_v32, %v588_v31 }
 0x109   : > { %v690_v34 = vadd.f32 %v2039_v59, %v682_v33 }
 0x10a   : > { %v2139_v35 = vpop.f32.mrf.mxu2  ;;  %v2141_v29 = vpop.f32.mrf.mxu3 }
 0x10b   : > { %698 = vst [vmem:[%s2047_s6 + $0x68] sm:$0xff] %v690_v34  ;;  %v590_v36 = vpop.f32.mrf.mxu0 }
 0x10c   : > { %v591_v38 = vadd.f32 %v590_v36, %v2102_v45  ;;  %v828_v36 = vadd.f32 %v2141_v29, %v2139_v35 }
 0x10e   : > { %v671_v39 = vpop.f32.mrf.mxu1 }
 0x10f   : > { %v683_v40 = vadd.f32 %v671_v39, %v591_v38 }
 0x111   : > { %v691_v41 = vadd.f32 %v2039_v59, %v683_v40 }
 0x112   : > { %v2146_v42 = vpop.f32.mrf.mxu2  ;;  %v2148_v37 = vpop.f32.mrf.mxu3 }
 0x113   : > { %699 = vst [vmem:[%s2047_s6 + $0x70] sm:$0xff] %v691_v41  ;;  %v593_v43 = vpop.f32.mrf.mxu0 }
 0x114   : > { %v594_v44 = vadd.f32 %v593_v43, %v546_v54 }
 0x116   : > { %v674_v46 = vpop.f32.mrf.mxu1 }
 0x117   : > { %v684_v47 = vadd.f32 %v674_v46, %v594_v44 }
 0x119   : > { %v692_v48 = vadd.f32 %v2039_v59, %v684_v47  ;;  %v831_v47 = vadd.f32 %v2148_v37, %v2146_v42 }
 0x11a   : > { %v2152_v50 = vpop.f32.mrf.mxu2  ;;  %v2154_v45 = vpop.f32.mrf.mxu3 }
 0x11b   : > { %700 = vst [vmem:[%s2047_s6 + $0x78] sm:$0xff] %v692_v48  ;;  %v893_v52 = vpop.f32.mrf.mxu0 }
 0x11c   : > { %v917_v51 = vadd.f32 %v893_v52, %v813_v49 }
 0x11e   : > { %v925_v53 = vadd.f32 %v2039_v59, %v917_v51  ;;  %v1005_v55 = vpop.f32.mrf.mxu1 }
 0x120   : > { %933 = vst [vmem:[%s2047_s6 + $0x80] sm:$0xff] %v925_v53 }
 0x122   : > { %v1052_v54 = vpop.f32.mrf.mxu2  ;;  %v1133_v57 = vpop.f32.mrf.mxu3 }
 0x123   : > { %v1053_v58 = vadd.f32 %v1052_v54, %v1005_v55  ;;  %v896_v60 = vpop.f32.mrf.mxu0  ;;  %v834_v54 = vadd.f32 %v2154_v45, %v2152_v50 }
 0x124   : > { %v918_v62 = vadd.f32 %v896_v60, %v816_v56 }
 0x125   : > { %v1157_v63 = vadd.f32 %v1133_v57, %v1053_v58 }
 0x126   : > { %v926_v0 = vadd.f32 %v2039_v59, %v918_v62  ;;  %v1008_v1 = vpop.f32.mrf.mxu1 }
 0x127   : > { %v1165_v2 = vadd.f32 %v2039_v59, %v1157_v63 }
 0x128   : > { %934 = vst [vmem:[%s2047_s6 + $0x88] sm:$0xff] %v926_v0 }
 0x129   : > { %1173 = vst [vmem:[%s2047_s6 + $0xc0] sm:$0xff] %v1165_v2 }
 0x12a   : > { %v1055_v4 = vpop.f32.mrf.mxu2  ;;  %v1136_v6 = vpop.f32.mrf.mxu3 }
 0x12b   : > { %v1056_v7 = vadd.f32 %v1055_v4, %v1008_v1  ;;  %v899_v61 = vpop.f32.mrf.mxu0 }
 0x12c   : > { %v919_v8 = vadd.f32 %v899_v61, %v819_v3 }
 0x12d   : > { %v1158_v9 = vadd.f32 %v1136_v6, %v1056_v7 }
 0x12e   : > { %v927_v10 = vadd.f32 %v2039_v59, %v919_v8  ;;  %v1011_v11 = vpop.f32.mrf.mxu1 }
 0x12f   : > { %v1166_v12 = vadd.f32 %v2039_v59, %v1158_v9 }
 0x130   : > { %935 = vst [vmem:[%s2047_s6 + $0x90] sm:$0xff] %v927_v10 }
 0x131   : > { %1174 = vst [vmem:[%s2047_s6 + $0xc8] sm:$0xff] %v1166_v12 }
 0x132   : > { %v1058_v5 = vpop.f32.mrf.mxu2  ;;  %v1139_v15 = vpop.f32.mrf.mxu3 }
 0x133   : > { %v1059_v16 = vadd.f32 %v1058_v5, %v1011_v11  ;;  %v902_v17 = vpop.f32.mrf.mxu0 }
 0x134   : > { %v920_v18 = vadd.f32 %v902_v17, %v822_v14 }
 0x135   : > { %v1159_v19 = vadd.f32 %v1139_v15, %v1059_v16 }
 0x136   : > { %v928_v20 = vadd.f32 %v2039_v59, %v920_v18  ;;  %v1014_v13 = vpop.f32.mrf.mxu1 }
 0x137   : > { %v1167_v24 = vadd.f32 %v2039_v59, %v1159_v19 }
 0x138   : > { %936 = vst [vmem:[%s2047_s6 + $0x98] sm:$0xff] %v928_v20 }
 0x139   : > { %1175 = vst [vmem:[%s2047_s6 + $0xd0] sm:$0xff] %v1167_v24 }
 0x13a   : > { %v1061_v26 = vpop.f32.mrf.mxu2  ;;  %v1142_v22 = vpop.f32.mrf.mxu3 }
 0x13b   : > { %v1062_v23 = vadd.f32 %v1061_v26, %v1014_v13  ;;  %v905_v27 = vpop.f32.mrf.mxu0 }
 0x13c   : > { %v921_v30 = vadd.f32 %v905_v27, %v825_v25 }
 0x13d   : > { %v1160_v31 = vadd.f32 %v1142_v22, %v1062_v23 }
 0x13e   : > { %v929_v32 = vadd.f32 %v2039_v59, %v921_v30  ;;  %v1017_v33 = vpop.f32.mrf.mxu1 }
 0x13f   : > { %v1168_v34 = vadd.f32 %v2039_v59, %v1160_v31 }
 0x140   : > { %937 = vst [vmem:[%s2047_s6 + $0xa0] sm:$0xff] %v929_v32 }
 0x141   : > { %1176 = vst [vmem:[%s2047_s6 + $0xd8] sm:$0xff] %v1168_v34 }
 0x142   : > { %v1064_v38 = vpop.f32.mrf.mxu2  ;;  %v1145_v28 = vpop.f32.mrf.mxu3 }
 0x143   : > { %v1065_v21 = vadd.f32 %v1064_v38, %v1017_v33  ;;  %v908_v39 = vpop.f32.mrf.mxu0 }
 0x144   : > { %v922_v40 = vadd.f32 %v908_v39, %v828_v36 }
 0x145   : > { %v1161_v41 = vadd.f32 %v1145_v28, %v1065_v21 }
 0x146   : > { %v930_v43 = vadd.f32 %v2039_v59, %v922_v40  ;;  %v1020_v44 = vpop.f32.mrf.mxu1 }
 0x147   : > { %v1169_v46 = vadd.f32 %v2039_v59, %v1161_v41 }
 0x148   : > { %938 = vst [vmem:[%s2047_s6 + $0xa8] sm:$0xff] %v930_v43 }
 0x149   : > { %1177 = vst [vmem:[%s2047_s6 + $0xe0] sm:$0xff] %v1169_v46 }
 0x14a   : > { %v1067_v48 = vpop.f32.mrf.mxu2  ;;  %v1148_v35 = vpop.f32.mrf.mxu3 }
 0x14b   : > { %v1068_v29 = vadd.f32 %v1067_v48, %v1020_v44  ;;  %v911_v49 = vpop.f32.mrf.mxu0 }
 0x14c   : > { %v923_v52 = vadd.f32 %v911_v49, %v831_v47 }
 0x14d   : > { %v1162_v51 = vadd.f32 %v1148_v35, %v1068_v29 }
 0x14e   : > { %v931_v53 = vadd.f32 %v2039_v59, %v923_v52  ;;  %v1023_v55 = vpop.f32.mrf.mxu1 }
 0x14f   : > { %v1170_v56 = vadd.f32 %v2039_v59, %v1162_v51 }
 0x150   : > { %939 = vst [vmem:[%s2047_s6 + $0xb0] sm:$0xff] %v931_v53 }
 0x151   : > { %1178 = vst [vmem:[%s2047_s6 + $0xe8] sm:$0xff] %v1170_v56 }
 0x152   : > { %v1070_v42 = vpop.f32.mrf.mxu2  ;;  %v1151_v37 = vpop.f32.mrf.mxu3 }
 0x153   : > { %v1071_v57 = vadd.f32 %v1070_v42, %v1023_v55  ;;  %v914_v58 = vpop.f32.mrf.mxu0 }
 0x154   : > { %v924_v60 = vadd.f32 %v914_v58, %v834_v54 }
 0x155   : > { %v1163_v62 = vadd.f32 %v1151_v37, %v1071_v57 }
 0x156   : > { %v932_v63 = vadd.f32 %v2039_v59, %v924_v60  ;;  %v1026_v1 = vpop.f32.mrf.mxu1 }
 0x157   : > { %v1171_v0 = vadd.f32 %v2039_v59, %v1163_v62 }
 0x158   : > { %940 = vst [vmem:[%s2047_s6 + $0xb8] sm:$0xff] %v932_v63 }
 0x159   : > { %1179 = vst [vmem:[%s2047_s6 + $0xf0] sm:$0xff] %v1171_v0 }
 0x15a   : > { %v1073_v50 = vpop.f32.mrf.mxu2  ;;  %v1154_v45 = vpop.f32.mrf.mxu3 }
 0x15b   : > { %v1074_v2 = vadd.f32 %v1073_v50, %v1026_v1 }
 0x15d   : > { %v1164_v3 = vadd.f32 %v1154_v45, %v1074_v2 }
 0x15f   : > { %v1172_v4 = vadd.f32 %v2039_v59, %v1164_v3 }
 0x161   : > { %1180 = vst [vmem:[%s2047_s6 + $0xf8] sm:$0xff] %v1172_v4 }
 0x162   : > { %1597 = shalt.err (!%p1594_p5)
}
 0x163   : > { %s1650_s29 = smov 128   ;;  %s1651_s4 = smov 8  }
 0x164   : > { %1512 = dma.vmem_to_hbm [thread:$0]  (%p1712_p4), %s1196_s10, 4096, %s1198_s11, %s1182_s15, %s1650_s29, %s1650_s29, %s1651_s4  }
 0x165 PF: > { %p1518_p6 = scmp.ge.s32.totalorder %s1648_s17, 2  ;;  %s1212_s5 = sand.u32 1, %s1628_s12  }
 0x166   : > { %s1213_s6 = scalar_lea.sflag [#allocation3], %s1212_s5 }
 0x167   : > { %p1515_p7 = pnand %p1518_p6, %p1719_p8 }
 0x169   : > { %p1516_p9 = pneg %p1515_p7 }
 0x16b   : > { %1623 = dma.done.wait (%p1516_p9), %s1213_s6, 4096  }
 0x16c   : > { %1625 = vsyncadd (%p1516_p9), %s1213_s6, 4294963200  ;;  %s16_s17 = sadd.s32 1, %s1648_s17   ;;  %s2244_s12 = smov %s1632_s13 }
 0x16d   : > { %p13_p10 = scmp.ge.s32.totalorder %s16_s17, 4   ;;  %s2245_s13 = smov %s1636_s14 }
 0x16e   : > { %s2246_s14 = smov %s1725_s25  ;;  %s2247_s15 = smov %s1644_s16 }
 0x16f   : > { %s2248_s16 = smov %s2250_s20  ;;  %15 = sbr.rel (!%p13_p10) target bundleno = 4 (0x4), region = 78 }
 0x174   :  { %1219 = vsyncpa [#allocation3], 1 }
 0x175   :  { %1221 = vsyncpa [#allocation3 + $0x1], 1 }

</bundles_post_ra>
